<compile_context>
chip_gen: v7x
topology: tpu7x:2x2x1
jax: 0.10.0
libtpu: 0.0.40
codegen_flags: <defaults>
</compile_context>

<pallas_src>
import math
import functools

import jax
import jax.numpy as jnp
from jax.experimental import pallas as pl
from jax.experimental.pallas import tpu as pltpu

LN_EPS = 1e-5  # nn.LayerNorm default
_INV_SQRT2 = 1.0 / math.sqrt(2.0)


def _round_up(x, m):
    return ((x + m - 1) // m) * m


def _ffn_kernel(x_ref, g_ref, beta_ref, w1_ref, b1_ref, w2_ref, b2_ref,
                o_ref, xn_sc, acc_sc):
    # Grid: (row-tile index i, hidden-chunk index h). h is the innermost / reduction-like axis.
    h_idx = pl.program_id(1)

    # First hidden chunk for this row tile: do LayerNorm once, cache bf16 activations,
    # zero the f32 output accumulator.
    @pl.when(h_idx == 0)
    def _():
        x = x_ref[...].astype(jnp.float32)
        mean = jnp.mean(x, axis=-1, keepdims=True)
        cx = x - mean
        var = jnp.mean(cx * cx, axis=-1, keepdims=True)
        xn = cx * jax.lax.rsqrt(var + LN_EPS)
        xn = xn * g_ref[...] + beta_ref[...]
        xn_sc[...] = xn.astype(jnp.bfloat16)      # bf16 MXU operand; accumulation stays f32
        acc_sc[...] = jnp.zeros_like(acc_sc)

    # ---- Linear(dim -> hidden chunk): bf16 x bf16 on the MXU, f32 accumulate ----
    h = jnp.dot(xn_sc[...], w1_ref[...], preferred_element_type=jnp.float32)
    h = h + b1_ref[...]

    # ---- GELU (exact erf, matches torch.nn.GELU default), f32 on VPU/EUP ----
    h = 0.5 * h * (1.0 + jax.lax.erf(h * _INV_SQRT2))

    # ---- Dropout(p=0.0) -> identity ----
    # TODO(synk): training-mode dropout (p>0) would need pltpu.prng_* masking; p=0 here.

    # ---- Linear(hidden chunk -> dim): accumulate into the resident f32 accumulator ----
    acc_sc[...] += jnp.dot(h.astype(jnp.bfloat16), w2_ref[...],
                           preferred_element_type=jnp.float32)

    # Last hidden chunk: add output bias once, write the lane-dense output tile.
    @pl.when(h_idx == pl.num_programs(1) - 1)
    def _():
        o_ref[...] = (acc_sc[...] + b2_ref[...]).astype(o_ref.dtype)


@functools.partial(jax.jit, static_argnames=("tile_m", "tile_h"))
def feed_forward(x, gamma, beta, w1, b1, w2, b2, *, tile_m=256, tile_h=512):
    """x: (B, N, dim) float32. Returns (B, N, dim)."""
    B, N, dim = x.shape
    hidden = w1.shape[1]
    M = B * N

    # Shape-adaptive effective tiles: rows in multiples of 8, hidden chunks in multiples of 128.
    tm = min(tile_m, _round_up(M, 8))
    th = min(tile_h, _round_up(hidden, 128))
    Mp = _round_up(M, tm)
    Hp = _round_up(hidden, th)

    x2 = x.reshape(M, dim)
    if Mp != M:
        x2 = jnp.pad(x2, ((0, Mp - M), (0, 0)))

    # Weights go through the MXU as bf16; LN params / biases stay f32.
    w1b = w1.astype(jnp.bfloat16)
    w2b = w2.astype(jnp.bfloat16)
    b1_2 = b1.astype(jnp.float32).reshape(1, hidden)
    if Hp != hidden:
        # Zero-padded hidden columns contribute GELU(0)=0 -> exact no-op in the second matmul.
        w1b = jnp.pad(w1b, ((0, 0), (0, Hp - hidden)))
        w2b = jnp.pad(w2b, ((0, Hp - hidden), (0, 0)))
        b1_2 = jnp.pad(b1_2, ((0, 0), (0, Hp - hidden)))

    g2 = gamma.astype(jnp.float32).reshape(1, dim)
    be2 = beta.astype(jnp.float32).reshape(1, dim)
    b2_2 = b2.astype(jnp.float32).reshape(1, dim)

    grid = (Mp // tm, Hp // th)

    # Explicit VMEM budget: double-buffered in/out tiles + bf16 weight chunks + resident scratch.
    est = (2 * tm * dim * 4            # x tiles (f32, 2 buffers)
           + 2 * tm * dim * 4          # output tiles (f32, 2 buffers)
           + 2 * dim * th * 2          # W1 chunk (bf16, 2 buffers)
           + 2 * th * dim * 2          # W2 chunk (bf16, 2 buffers)
           + 2 * th * 4                # b1 chunk
           + 6 * dim * 4               # gamma/beta/b2
           + tm * dim * 2              # xn scratch (bf16)
           + tm * dim * 4)             # accumulator scratch (f32)
    vmem_limit = min(max(int(est * 1.5) + (8 << 20), 32 << 20), 64 << 20)

    out = pl.pallas_call(
        _ffn_kernel,
        out_shape=jax.ShapeDtypeStruct((Mp, dim), x.dtype),
        grid_spec=pltpu.PrefetchScalarGridSpec(
            num_scalar_prefetch=0,
            grid=grid,
            in_specs=[
                pl.BlockSpec((tm, dim), lambda i, h: (i, 0)),    # x row tile
                pl.BlockSpec((1, dim), lambda i, h: (0, 0)),     # LN gamma
                pl.BlockSpec((1, dim), lambda i, h: (0, 0)),     # LN beta
                pl.BlockSpec((dim, th), lambda i, h: (0, h)),    # W1 column chunk
                pl.BlockSpec((1, th), lambda i, h: (0, h)),      # b1 chunk
                pl.BlockSpec((th, dim), lambda i, h: (h, 0)),    # W2 row chunk
                pl.BlockSpec((1, dim), lambda i, h: (0, 0)),     # b2
            ],
            out_specs=pl.BlockSpec((tm, dim), lambda i, h: (i, 0)),
            scratch_shapes=[
                pltpu.VMEM((tm, dim), jnp.bfloat16),   # cached LayerNorm output
                pltpu.VMEM((tm, dim), jnp.float32),    # output accumulator
            ],
        ),
        compiler_params=pltpu.CompilerParams(
            dimension_semantics=("parallel", "arbitrary"),
            vmem_limit_bytes=vmem_limit,
        ),
    )(x2, g2, be2, w1b, b1_2, w2b, b2_2)

    if Mp != M:
        out = out[:M]
    return out.reshape(B, N, dim)


def _reference(x, gamma, beta, w1, b1, w2, b2):
    mean = jnp.mean(x, axis=-1, keepdims=True)
    var = jnp.mean((x - mean) ** 2, axis=-1, keepdims=True)
    xn = (x - mean) / jnp.sqrt(var + LN_EPS) * gamma + beta
    h = xn @ w1 + b1
    h = 0.5 * h * (1.0 + jax.lax.erf(h / math.sqrt(2.0)))
    return h @ w2 + b2


if __name__ == "__main__":
    # Small but lane-dense shapes consistent with the module (dim multiple of 128).
    B, N, dim, hidden = 2, 64, 128, 256  # M = 128 tokens

    key = jax.random.PRNGKey(0)
    kx, kg, kb, kw1, kb1, kw2, kb2 = jax.random.split(key, 7)

    x = jax.random.normal(kx, (B, N, dim), dtype=jnp.float32)

    # Deterministic parameter init (synthetic, torch-linear-like scale).
    gamma = jnp.ones((dim,), jnp.float32) + 0.01 * jax.random.normal(kg, (dim,))
    beta = 0.01 * jax.random.normal(kb, (dim,))
    w1 = jax.random.normal(kw1, (dim, hidden), jnp.float32) * (1.0 / math.sqrt(dim))
    b1 = jax.random.normal(kb1, (hidden,), jnp.float32) * (1.0 / math.sqrt(dim))
    w2 = jax.random.normal(kw2, (hidden, dim), jnp.float32) * (1.0 / math.sqrt(hidden))
    b2 = jax.random.normal(kb2, (dim,), jnp.float32) * (1.0 / math.sqrt(hidden))

    y = feed_forward(x, gamma, beta, w1, b1, w2, b2)
    y = jax.block_until_ready(y)

    y_ref = _reference(x, gamma, beta, w1, b1, w2, b2)
    assert y.shape == (B, N, dim)
    # bf16 MXU operands (f32 accumulation) -> loosened tolerance vs. f32 reference.
    assert jnp.allclose(y, y_ref, atol=5e-2, rtol=5e-2), "mismatch vs reference"

    print("KERNEL_OK")
</pallas_src>

<mosaic_0001>
module attributes {stable_mosaic.version = 11 : i64} {
  func.func @_ffn_kernel(%arg0: i32, %arg1: i32, %arg2: memref<128x128xf32, #tpu.memory_space<vmem>>, %arg3: memref<1x128xf32, #tpu.memory_space<vmem>>, %arg4: memref<1x128xf32, #tpu.memory_space<vmem>>, %arg5: memref<128x256xbf16, #tpu.memory_space<vmem>>, %arg6: memref<1x256xf32, #tpu.memory_space<vmem>>, %arg7: memref<256x128xbf16, #tpu.memory_space<vmem>>, %arg8: memref<1x128xf32, #tpu.memory_space<vmem>>, %arg9: memref<128x128xf32, #tpu.memory_space<vmem>>, %arg10: memref<128x128xbf16, #tpu.memory_space<vmem>>, %arg11: memref<128x128xf32, #tpu.memory_space<vmem>>) attributes {dimension_semantics = [#tpu.dimension_semantics<parallel>, #tpu.dimension_semantics<arbitrary>], iteration_bounds = array<i64: 1, 1>, scalar_prefetch = 0 : i64, scratch_operands = 2 : i64, tpu.core_type = #tpu.core_type<tc>, window_params = [{transform_indices = @transform_0, window_bounds = array<i64: 128, 128>}, {pipeline_mode = #tpu.pipeline_mode<synchronous>, transform_indices = @transform_1, window_bounds = array<i64: 1, 128>}, {pipeline_mode = #tpu.pipeline_mode<synchronous>, transform_indices = @transform_2, window_bounds = array<i64: 1, 128>}, {transform_indices = @transform_3, window_bounds = array<i64: 128, 256>}, {transform_indices = @transform_4, window_bounds = array<i64: 1, 256>}, {transform_indices = @transform_5, window_bounds = array<i64: 256, 128>}, {pipeline_mode = #tpu.pipeline_mode<synchronous>, transform_indices = @transform_6, window_bounds = array<i64: 1, 128>}, {transform_indices = @transform_7, window_bounds = array<i64: 128, 128>}]} {
    %c0_i32 = arith.constant 0 : i32
    %0 = arith.cmpi eq, %arg1, %c0_i32 : i32
    %1 = arith.extui %0 : i1 to i32
    %c0_i32_0 = arith.constant 0 : i32
    %2 = arith.cmpi ne, %1, %c0_i32_0 : i32
    scf.if %2 {
      %c0_18 = arith.constant 0 : index
      %c0_19 = arith.constant 0 : index
      %26 = vector.load %arg2[%c0_18, %c0_19] : memref<128x128xf32, #tpu.memory_space<vmem>>, vector<128x128xf32>
      %cst_20 = arith.constant dense<0.000000e+00> : vector<128xf32>
      %27 = vector.multi_reduction <add>, %26, %cst_20 [1] : vector<128x128xf32> to vector<128xf32>
      %28 = vector.shape_cast %27 : vector<128xf32> to vector<128x1xf32>
      %cst_21 = arith.constant 1.280000e+02 : f32
      %29 = vector.broadcast %cst_21 : f32 to vector<128x1xf32>
      %30 = arith.divf %28, %29 : vector<128x1xf32>
      %31 = vector.broadcast %30 : vector<128x1xf32> to vector<128x128xf32>
      %32 = arith.subf %26, %31 : vector<128x128xf32>
      %33 = arith.mulf %32, %32 : vector<128x128xf32>
      %cst_22 = arith.constant dense<0.000000e+00> : vector<128xf32>
      %34 = vector.multi_reduction <add>, %33, %cst_22 [1] : vector<128x128xf32> to vector<128xf32>
      %35 = vector.shape_cast %34 : vector<128xf32> to vector<128x1xf32>
      %cst_23 = arith.constant 1.280000e+02 : f32
      %36 = vector.broadcast %cst_23 : f32 to vector<128x1xf32>
      %37 = arith.divf %35, %36 : vector<128x1xf32>
      %cst_24 = arith.constant 9.99999974E-6 : f32
      %38 = vector.broadcast %cst_24 : f32 to vector<128x1xf32>
      %39 = arith.addf %37, %38 : vector<128x1xf32>
      %40 = math.rsqrt %39 : vector<128x1xf32>
      %41 = vector.broadcast %40 : vector<128x1xf32> to vector<128x128xf32>
      %42 = arith.mulf %32, %41 : vector<128x128xf32>
      %c0_25 = arith.constant 0 : index
      %c0_26 = arith.constant 0 : index
      %43 = vector.load %arg3[%c0_25, %c0_26] : memref<1x128xf32, #tpu.memory_space<vmem>>, vector<1x128xf32>
      %44 = vector.broadcast %43 : vector<1x128xf32> to vector<128x128xf32>
      %45 = arith.mulf %42, %44 : vector<128x128xf32>
      %c0_27 = arith.constant 0 : index
      %c0_28 = arith.constant 0 : index
      %46 = vector.load %arg4[%c0_27, %c0_28] : memref<1x128xf32, #tpu.memory_space<vmem>>, vector<1x128xf32>
      %47 = vector.broadcast %46 : vector<1x128xf32> to vector<128x128xf32>
      %48 = arith.addf %45, %47 : vector<128x128xf32>
      %49 = arith.truncf %48 : vector<128x128xf32> to vector<128x128xbf16>
      %c0_29 = arith.constant 0 : index
      %c0_30 = arith.constant 0 : index
      %50 = vector.load %arg10[%c0_29, %c0_30] : memref<128x128xbf16, #tpu.memory_space<vmem>>, vector<128x128xbf16>
      tpu.vector_store %arg10[%c0_29, %c0_30], %49 {strides = array<i32>} : memref<128x128xbf16, #tpu.memory_space<vmem>>, vector<128x128xbf16>,
      %cst_31 = arith.constant 0.000000e+00 : f32
      %51 = vector.broadcast %cst_31 : f32 to vector<128x128xf32>
      %c0_32 = arith.constant 0 : index
      %c0_33 = arith.constant 0 : index
      %52 = vector.load %arg11[%c0_32, %c0_33] : memref<128x128xf32, #tpu.memory_space<vmem>>, vector<128x128xf32>
      tpu.vector_store %arg11[%c0_32, %c0_33], %51 {strides = array<i32>} : memref<128x128xf32, #tpu.memory_space<vmem>>, vector<128x128xf32>,
    } else {
    }
    %c0 = arith.constant 0 : index
    %c0_1 = arith.constant 0 : index
    %3 = vector.load %arg10[%c0, %c0_1] : memref<128x128xbf16, #tpu.memory_space<vmem>>, vector<128x128xbf16>
    %c0_2 = arith.constant 0 : index
    %c0_3 = arith.constant 0 : index
    %4 = vector.load %arg5[%c0_2, %c0_3] : memref<128x256xbf16, #tpu.memory_space<vmem>>, vector<128x256xbf16>
    %cst = arith.constant dense<0.000000e+00> : vector<128x256xf32>
    %5 = tpu.matmul %3, %4, %cst {dimension_numbers = #tpu.dot_dimension_numbers<[1], [0], [0], [1], [0, 0, 1, 1], [], []>} : vector<128x128xbf16>, vector<128x256xbf16>, vector<128x256xf32> -> vector<128x256xf32>
    %c0_4 = arith.constant 0 : index
    %c0_5 = arith.constant 0 : index
    %6 = vector.load %arg6[%c0_4, %c0_5] : memref<1x256xf32, #tpu.memory_space<vmem>>, vector<1x256xf32>
    %7 = vector.broadcast %6 : vector<1x256xf32> to vector<128x256xf32>
    %8 = arith.addf %5, %7 : vector<128x256xf32>
    %cst_6 = arith.constant 5.000000e-01 : f32
    %9 = vector.broadcast %cst_6 : f32 to vector<128x256xf32>
    %10 = arith.mulf %9, %8 : vector<128x256xf32>
    %cst_7 = arith.constant 0.707106769 : f32
    %11 = vector.broadcast %cst_7 : f32 to vector<128x256xf32>
    %12 = arith.mulf %8, %11 : vector<128x256xf32>
    %13 = math.erf %12 : vector<128x256xf32>
    %cst_8 = arith.constant 1.000000e+00 : f32
    %14 = vector.broadcast %cst_8 : f32 to vector<128x256xf32>
    %15 = arith.addf %14, %13 : vector<128x256xf32>
    %16 = arith.mulf %10, %15 : vector<128x256xf32>
    %c0_9 = arith.constant 0 : index
    %c0_10 = arith.constant 0 : index
    %17 = vector.load %arg11[%c0_9, %c0_10] : memref<128x128xf32, #tpu.memory_space<vmem>>, vector<128x128xf32>
    %18 = arith.truncf %16 : vector<128x256xf32> to vector<128x256xbf16>
    %c0_11 = arith.constant 0 : index
    %c0_12 = arith.constant 0 : index
    %19 = vector.load %arg7[%c0_11, %c0_12] : memref<256x128xbf16, #tpu.memory_space<vmem>>, vector<256x128xbf16>
    %cst_13 = arith.constant dense<0.000000e+00> : vector<128x128xf32>
    %20 = tpu.matmul %18, %19, %cst_13 {dimension_numbers = #tpu.dot_dimension_numbers<[1], [0], [0], [1], [0, 0, 1, 1], [], []>} : vector<128x256xbf16>, vector<256x128xbf16>, vector<128x128xf32> -> vector<128x128xf32>
    %21 = arith.addf %17, %20 : vector<128x128xf32>
    %c0_14 = arith.constant 0 : index
    %c0_15 = arith.constant 0 : index
    %22 = vector.load %arg11[%c0_14, %c0_15] : memref<128x128xf32, #tpu.memory_space<vmem>>, vector<128x128xf32>
    tpu.vector_store %arg11[%c0_14, %c0_15], %21 {strides = array<i32>} : memref<128x128xf32, #tpu.memory_space<vmem>>, vector<128x128xf32>,
    %c0_i32_16 = arith.constant 0 : i32
    %23 = arith.cmpi eq, %arg1, %c0_i32_16 : i32
    %24 = arith.extui %23 : i1 to i32
    %c0_i32_17 = arith.constant 0 : i32
    %25 = arith.cmpi ne, %24, %c0_i32_17 : i32
    scf.if %25 {
      %c0_18 = arith.constant 0 : index
      %c0_19 = arith.constant 0 : index
      %26 = vector.load %arg11[%c0_18, %c0_19] : memref<128x128xf32, #tpu.memory_space<vmem>>, vector<128x128xf32>
      %c0_20 = arith.constant 0 : index
      %c0_21 = arith.constant 0 : index
      %27 = vector.load %arg8[%c0_20, %c0_21] : memref<1x128xf32, #tpu.memory_space<vmem>>, vector<1x128xf32>
      %28 = vector.broadcast %27 : vector<1x128xf32> to vector<128x128xf32>
      %29 = arith.addf %26, %28 : vector<128x128xf32>
      %c0_22 = arith.constant 0 : index
      %c0_23 = arith.constant 0 : index
      %30 = vector.load %arg9[%c0_22, %c0_23] : memref<128x128xf32, #tpu.memory_space<vmem>>, vector<128x128xf32>
      tpu.vector_store %arg9[%c0_22, %c0_23], %29 {strides = array<i32>} : memref<128x128xf32, #tpu.memory_space<vmem>>, vector<128x128xf32>,
    } else {
    }
    return
  }
  func.func @transform_0(%arg0: i32, %arg1: i32) -> (i32, i32) {
    %c0_i32 = arith.constant 0 : i32
    %c0_i32_0 = arith.constant 0 : i32
    return %arg0, %c0_i32 : i32, i32
  }
  func.func @transform_1(%arg0: i32, %arg1: i32) -> (i32, i32) {
    %c0_i32 = arith.constant 0 : i32
    %c0_i32_0 = arith.constant 0 : i32
    %c0_i32_1 = arith.constant 0 : i32
    return %c0_i32, %c0_i32_0 : i32, i32
  }
  func.func @transform_2(%arg0: i32, %arg1: i32) -> (i32, i32) {
    %c0_i32 = arith.constant 0 : i32
    %c0_i32_0 = arith.constant 0 : i32
    %c0_i32_1 = arith.constant 0 : i32
    return %c0_i32, %c0_i32_0 : i32, i32
  }
  func.func @transform_3(%arg0: i32, %arg1: i32) -> (i32, i32) {
    %c0_i32 = arith.constant 0 : i32
    %c0_i32_0 = arith.constant 0 : i32
    return %c0_i32, %arg1 : i32, i32
  }
  func.func @transform_4(%arg0: i32, %arg1: i32) -> (i32, i32) {
    %c0_i32 = arith.constant 0 : i32
    %c0_i32_0 = arith.constant 0 : i32
    return %c0_i32, %arg1 : i32, i32
  }
  func.func @transform_5(%arg0: i32, %arg1: i32) -> (i32, i32) {
    %c0_i32 = arith.constant 0 : i32
    %c0_i32_0 = arith.constant 0 : i32
    return %arg1, %c0_i32 : i32, i32
  }
  func.func @transform_6(%arg0: i32, %arg1: i32) -> (i32, i32) {
    %c0_i32 = arith.constant 0 : i32
    %c0_i32_0 = arith.constant 0 : i32
    %c0_i32_1 = arith.constant 0 : i32
    return %c0_i32, %c0_i32_0 : i32, i32
  }
  func.func @transform_7(%arg0: i32, %arg1: i32) -> (i32, i32) {
    %c0_i32 = arith.constant 0 : i32
    %c0_i32_0 = arith.constant 0 : i32
    return %arg0, %c0_i32 : i32, i32
  }
}

</mosaic_0001>

<bundles_post_ra>
// kernel: feed_forward.1
= control target key start
LH: loop header
LB: loop body
LE: loop exit
PB: predicated region body
PF: predicated region fallthrough
CT: control target
= control target key end

     0   :  { %s1796_s0 = inlined_call_operand.vmem [shape: f32[128,128], index: 0, kind: input, shape index: {}]   ;;  %s1797_s1 = inlined_call_operand.vmem [shape: f32[1,128], index: 1, kind: input, shape index: {}]   ;;  %s1798_s2 = inlined_call_operand.vmem [shape: f32[1,128], index: 2, kind: input, shape index: {}]   ;;  %s1799_s3 = inlined_call_operand.vmem [shape: bf16[128,256], index: 3, kind: input, shape index: {}]   ;;  %s1800_s4 = inlined_call_operand.vmem [shape: f32[1,256], index: 4, kind: input, shape index: {}]   ;;  %s1801_s5 = inlined_call_operand.vmem [shape: bf16[256,128], index: 5, kind: input, shape index: {}]   ;;  %s1802_s6 = inlined_call_operand.vmem [shape: f32[1,128], index: 6, kind: input, shape index: {}]   ;;  %s1803_s7 = inlined_call_operand.hbm [shape: f32[128,128], index: 7, kind: output, shape index: {}]  }
   0x1   :  { %v32_v0 = vld [vmem:[%s1796_s0] sm:$0xff]  ;;  %v34_v1 = vld [vmem:[%s1796_s0 + $0x10] sm:$0xff]  ;;  %v33_v2 = vld [vmem:[%s1796_s0 + $0x8] sm:$0xff] }
   0x2   :  { %48 = vadd.xlane.f32.xlu0 %v32_v0  ;;  %52 = vadd.xlane.f32.xlu1 %v34_v1  ;;  %v35_v3 = vld [vmem:[%s1796_s0 + $0x18] sm:$0xff]  ;;  %v36_v4 = vld [vmem:[%s1796_s0 + $0x20] sm:$0xff]  ;;  %v37_v5 = vld [vmem:[%s1796_s0 + $0x28] sm:$0xff] }
   0x3   :  { %v38_v6 = vld [vmem:[%s1796_s0 + $0x30] sm:$0xff]  ;;  %v39_v7 = vld [vmem:[%s1796_s0 + $0x38] sm:$0xff]  ;;  %v1389_v8 = vld [vmem:[%s1796_s0 + $0x40] sm:$0xff] }
   0x4   :  { %v1394_v9 = vld [vmem:[%s1796_s0 + $0x48] sm:$0xff]  ;;  %v1399_v10 = vld [vmem:[%s1796_s0 + $0x50] sm:$0xff]  ;;  %v1404_v11 = vld [vmem:[%s1796_s0 + $0x58] sm:$0xff] }
   0x6   :  { %50 = vadd.xlane.f32.xlu0 %v33_v2  ;;  %54 = vadd.xlane.f32.xlu1 %v35_v3 }
   0xa   :  { %56 = vadd.xlane.f32.xlu0 %v36_v4  ;;  %58 = vadd.xlane.f32.xlu1 %v37_v5 }
   0xe   :  { %60 = vadd.xlane.f32.xlu0 %v38_v6  ;;  %62 = vadd.xlane.f32.xlu1 %v39_v7 }
  0x12   :  { %64 = vadd.xlane.f32.xlu0 %v1389_v8  ;;  %66 = vadd.xlane.f32.xlu1 %v1394_v9 }
  0x16   :  { %68 = vadd.xlane.f32.xlu0 %v1399_v10  ;;  %70 = vadd.xlane.f32.xlu1 %v1404_v11 }
  0x17   :  { %12 = vsyncpa [#allocation5], 0  ;;  %v1413_v12 = vld [vmem:[%s1796_s0 + $0x60] sm:$0xff]  ;;  %v1418_v13 = vld [vmem:[%s1796_s0 + $0x68] sm:$0xff] }
  0x18   :  { %v1425_v14 = vld [vmem:[%s1796_s0 + $0x70] sm:$0xff]  ;;  %v1430_v15 = vld [vmem:[%s1796_s0 + $0x78] sm:$0xff]  ;;  %v1158_v16 = vld [vmem:[%s1799_s3 + $0x4] ss:$8 sps:$4 sm:$0xff]  }
  0x19   :  { %v1160_v17 = vld [vmem:[%s1799_s3] ss:$8 sps:$4 sm:$0xff]   ;;  %v1161_v18 = vld [vmem:[%s1799_s3 + $0x14] ss:$8 sps:$4 sm:$0xff]   ;;  %419 = vmatprep.subr.bf16.mxu0 %v1158_v16  ;;  %v1163_v57 = vld [vmem:[%s1799_s3 + $0x10] ss:$8 sps:$4 sm:$0xff]  }
  0x1a   :  { %72 = vadd.xlane.f32.xlu0 %v1413_v12  ;;  %74 = vadd.xlane.f32.xlu1 %v1418_v13  ;;  %v1164_v63 = vld [vmem:[%s1799_s3 + $0x24] ss:$8 sps:$4 sm:$0xff]   ;;  %v1167_v16 = vld [vmem:[%s1799_s3 + $0x34] ss:$8 sps:$4 sm:$0xff]  }
  0x1b   :  { %420 = vmatpush1.bf16.msra.mxu0 %v1160_v17 }
  0x1c   :  { %421 = vmatprep.subr.bf16.mxu0 %v1161_v18 }
  0x1e   :  { %76 = vadd.xlane.f32.xlu0 %v1425_v14  ;;  %78 = vadd.xlane.f32.xlu1 %v1430_v15 }
  0x1f   :  { %422 = vmatpush1.bf16.msra.mxu0 %v1163_v57 }
  0x20   :  { %423 = vmatprep.subr.bf16.mxu0 %v1164_v63 }
  0x8f   :  { %v49_v19 = vpop.xlane.xlu0 %48  ;;  %v53_v20 = vpop.xlane.xlu1 %52 }
  0x90   :  { %v81_v21 = vmul.f32 0.0078125, %v49_v19  ;;  %v83_v22 = vmul.f32 0.0078125, %v53_v20  ;;  %v1169_v19 = vld [vmem:[%s1799_s3 + $0x30] ss:$8 sps:$4 sm:$0xff]  }
  0x92   :  { %v1443_v23 = vsub.f32 %v32_v0, %v81_v21  ;;  %v1445_v24 = vsub.f32 %v34_v1, %v83_v22 }
  0x93   :  { %v51_v25 = vpop.xlane.xlu0 %50  ;;  %v55_v26 = vpop.xlane.xlu1 %54 }
  0x94   :  { %v82_v27 = vmul.f32 0.0078125, %v51_v25  ;;  %v113_v28 = vmul.f32 %v1443_v23, %v1443_v23  ;;  %v84_v29 = vmul.f32 0.0078125, %v55_v26  ;;  %v115_v32 = vmul.f32 %v1445_v24, %v1445_v24  ;;  %v1170_v26 = vld [vmem:[%s1799_s3 + $0x44] ss:$8 sps:$4 sm:$0xff]  }
  0x96   :  { %v1449_v30 = vsub.f32 %v33_v2, %v82_v27  ;;  %129 = vadd.xlane.f32.xlu0 %v113_v28  ;;  %v1451_v31 = vsub.f32 %v35_v3, %v84_v29  ;;  %v1172_v27 = vld [vmem:[%s1799_s3 + $0x40] ss:$8 sps:$4 sm:$0xff]   ;;  %v1173_v28 = vld [vmem:[%s1799_s3 + $0x54] ss:$8 sps:$4 sm:$0xff]   ;;  %v1175_v29 = vld [vmem:[%s1799_s3 + $0x50] ss:$8 sps:$4 sm:$0xff]  }
  0x97   :  { %v57_v33 = vpop.xlane.xlu0 %56  ;;  %v59_v34 = vpop.xlane.xlu1 %58 }
  0x98   :  { %v85_v35 = vmul.f32 0.0078125, %v57_v33  ;;  %v114_v36 = vmul.f32 %v1449_v30, %v1449_v30  ;;  %v86_v37 = vmul.f32 0.0078125, %v59_v34  ;;  %v116_v40 = vmul.f32 %v1451_v31, %v1451_v31  ;;  %v1178_v33 = vld [vmem:[%s1799_s3 + $0x60] ss:$8 sps:$4 sm:$0xff]   ;;  %v1179_v34 = vld [vmem:[%s1799_s3 + $0x74] ss:$8 sps:$4 sm:$0xff]  }
  0x9a   :  { %v1457_v38 = vsub.f32 %v36_v4, %v85_v35  ;;  %133 = vadd.xlane.f32.xlu0 %v115_v32  ;;  %131 = vadd.xlane.f32.xlu1 %v114_v36  ;;  %v1459_v39 = vsub.f32 %v37_v5, %v86_v37  ;;  %v1166_v5 = vld [vmem:[%s1799_s3 + $0x20] ss:$8 sps:$4 sm:$0xff]   ;;  %v1176_v32 = vld [vmem:[%s1799_s3 + $0x64] ss:$8 sps:$4 sm:$0xff]   ;;  %v1181_v35 = vld [vmem:[%s1799_s3 + $0x70] ss:$8 sps:$4 sm:$0xff]  }
  0x9b   :  { %v61_v41 = vpop.xlane.xlu0 %60  ;;  %v63_v42 = vpop.xlane.xlu1 %62  ;;  %424 = vmatpush1.bf16.msra.mxu0 %v1166_v5  ;;  %v1318_v36 = vmov 0   ;;  %v1182_v37 = vld [vmem:[%s1801_s5 + $0x40] sm:$0xff]  }
  0x9c   :  { %v87_v43 = vmul.f32 0.0078125, %v61_v41  ;;  %v117_v44 = vmul.f32 %v1457_v38, %v1457_v38  ;;  %v88_v45 = vmul.f32 0.0078125, %v63_v42  ;;  %v118_v48 = vmul.f32 %v1459_v39, %v1459_v39  ;;  %425 = vmatprep.subr.bf16.mxu0 %v1167_v16  ;;  %451 = vmatprep.mubr.bf16.mxu0 %v1318_v36  ;;  %v1184_v41 = vld [vmem:[%s1801_s5 + $0x48] sm:$0xff]  }
  0x9d   :  { %1090 = vmatprep.subr.bf16.mxu1 %v1182_v37  ;;  %v1185_v42 = vld [vmem:[%s1801_s5 + $0x8] sm:$0xff]  }
  0x9e   :  { %v1465_v46 = vsub.f32 %v38_v6, %v87_v43  ;;  %135 = vadd.xlane.f32.xlu1 %v116_v40  ;;  %137 = vadd.xlane.f32.xlu0 %v117_v44  ;;  %v1467_v47 = vsub.f32 %v39_v7, %v88_v45  ;;  %v1183_v40 = vld [vmem:[%s1801_s5] sm:$0xff]  }
  0x9f   :  { %v65_v49 = vpop.xlane.xlu0 %64  ;;  %v67_v50 = vpop.xlane.xlu1 %66  ;;  %426 = vmatpush1.bf16.msra.mxu0 %v1169_v19  ;;  %1091 = vmatpush3.bf16.msra.mxu1 %v1183_v40 }
  0xa0   :  { %v89_v51 = vmul.f32 0.0078125, %v65_v49  ;;  %v119_v52 = vmul.f32 %v1465_v46, %v1465_v46  ;;  %v90_v53 = vmul.f32 0.0078125, %v67_v50  ;;  %v120_v56 = vmul.f32 %v1467_v47, %v1467_v47  ;;  %427 = vmatprep.subr.bf16.mxu0 %v1170_v26  ;;  %1092 = vmatprep.subr.bf16.mxu1 %v1184_v41 }
  0xa2   :  { %v1474_v54 = vsub.f32 %v1389_v8, %v89_v51  ;;  %139 = vadd.xlane.f32.xlu1 %v118_v48  ;;  %141 = vadd.xlane.f32.xlu0 %v119_v52  ;;  %v1477_v55 = vsub.f32 %v1394_v9, %v90_v53 }
  0xa3   :  { %v69_v58 = vpop.xlane.xlu0 %68  ;;  %v71_v59 = vpop.xlane.xlu1 %70  ;;  %428 = vmatpush1.bf16.msra.mxu0 %v1172_v27  ;;  %1093 = vmatpush3.bf16.msra.mxu1 %v1185_v42 }
  0xa4   :  { %v91_v60 = vmul.f32 0.0078125, %v69_v58  ;;  %v121_v61 = vmul.f32 %v1474_v54, %v1474_v54  ;;  %v92_v62 = vmul.f32 0.0078125, %v71_v59  ;;  %v122_v2 = vmul.f32 %v1477_v55, %v1477_v55  ;;  %429 = vmatprep.subr.bf16.mxu0 %v1173_v28 }
  0xa6   :  { %v1490_v0 = vsub.f32 %v1399_v10, %v91_v60  ;;  %143 = vadd.xlane.f32.xlu1 %v120_v56  ;;  %145 = vadd.xlane.f32.xlu0 %v121_v61  ;;  %v1493_v1 = vsub.f32 %v1404_v11, %v92_v62 }
  0xa7   :  { %v73_v3 = vpop.xlane.xlu0 %72  ;;  %v75_v4 = vpop.xlane.xlu1 %74  ;;  %430 = vmatpush1.bf16.msra.mxu0 %v1175_v29 }
  0xa8   :  { %v93_v6 = vmul.f32 0.0078125, %v73_v3  ;;  %v123_v7 = vmul.f32 %v1490_v0, %v1490_v0  ;;  %v94_v8 = vmul.f32 0.0078125, %v75_v4  ;;  %v124_v11 = vmul.f32 %v1493_v1, %v1493_v1  ;;  %431 = vmatprep.subr.bf16.mxu0 %v1176_v32 }
  0xaa   :  { %v1503_v9 = vsub.f32 %v1413_v12, %v93_v6  ;;  %147 = vadd.xlane.f32.xlu1 %v122_v2  ;;  %149 = vadd.xlane.f32.xlu0 %v123_v7  ;;  %v1506_v10 = vsub.f32 %v1418_v13, %v94_v8  ;;  %v1571_v8 = vld [vmem:[%s1797_s1] ss:$0 sm:$0xff] }
  0xab   :  { %v77_v17 = vpop.xlane.xlu0 %76  ;;  %v79_v18 = vpop.xlane.xlu1 %78  ;;  %432 = vmatpush1.bf16.msra.mxu0 %v1178_v33 }
  0xac   :  { %v95_v12 = vmul.f32 0.0078125, %v77_v17  ;;  %v125_v20 = vmul.f32 %v1503_v9, %v1503_v9  ;;  %v96_v21 = vmul.f32 0.0078125, %v79_v18  ;;  %v126_v25 = vmul.f32 %v1506_v10, %v1506_v10  ;;  %433 = vmatprep.subr.bf16.mxu0 %v1179_v34 }
  0xae   :  { %v1519_v13 = vsub.f32 %v1425_v14, %v95_v12  ;;  %151 = vadd.xlane.f32.xlu1 %v124_v11  ;;  %153 = vadd.xlane.f32.xlu0 %v125_v20  ;;  %v1522_v22 = vsub.f32 %v1430_v15, %v96_v21 }
  0xaf   :  { %434 = vmatpush1.bf16.msra.mxu0 %v1181_v35 }
  0xb0   :  { %v127_v14 = vmul.f32 %v1519_v13, %v1519_v13  ;;  %v128_v15 = vmul.f32 %v1522_v22, %v1522_v22 }
  0xb2   :  { %155 = vadd.xlane.f32.xlu1 %v126_v25  ;;  %157 = vadd.xlane.f32.xlu0 %v127_v14 }
  0xb6   :  { %159 = vadd.xlane.f32.xlu1 %v128_v15 }
 0x123   :  { %v130_v43 = vpop.xlane.xlu0 %129 }
 0x124   :  { %v161_v44 = vmul.f32 0.0078125, %v130_v43 }
 0x126   :  { %v177_v45 = vadd.f32 1e-05, %v161_v44 }
 0x127   :  { %v132_v48 = vpop.xlane.xlu1 %131  ;;  %v134_v49 = vpop.xlane.xlu0 %133 }
 0x128   :  { %1198 = vrsqrt.f32 %v177_v45  ;;  %v162_v50 = vmul.f32 0.0078125, %v132_v48  ;;  %v163_v51 = vmul.f32 0.0078125, %v134_v49 }
 0x12a   :  { %v178_v52 = vadd.f32 1e-05, %v162_v50  ;;  %v179_v53 = vadd.f32 1e-05, %v163_v51 }
 0x12b   :  { %v136_v56 = vpop.xlane.xlu1 %135  ;;  %v138_v57 = vpop.xlane.xlu0 %137 }
 0x12c   :  { %1200 = vrsqrt.f32 %v178_v52  ;;  %v164_v58 = vmul.f32 0.0078125, %v136_v56  ;;  %v165_v60 = vmul.f32 0.0078125, %v138_v57 }
 0x12d   :  { %1202 = vrsqrt.f32 %v179_v53 }
 0x12e   :  { %v180_v59 = vadd.f32 1e-05, %v164_v58  ;;  %v181_v2 = vadd.f32 1e-05, %v165_v60 }
 0x12f   :  { %v140_v61 = vpop.xlane.xlu1 %139  ;;  %v142_v4 = vpop.xlane.xlu0 %141 }
 0x130   :  { %1204 = vrsqrt.f32 %v180_v59  ;;  %v166_v62 = vmul.f32 0.0078125, %v140_v61  ;;  %v167_v16 = vmul.f32 0.0078125, %v142_v4 }
 0x132   :  { %v1199_v63 = vpop.eup %1198  ;;  %v182_v3 = vadd.f32 1e-05, %v166_v62  ;;  %v183_v26 = vadd.f32 1e-05, %v167_v16 }
 0x133   :  { %v144_v5 = vpop.xlane.xlu1 %143  ;;  %v209_v6 = vmul.f32 %v1199_v63, %v1443_v23  ;;  %v1578_v23 = vld [vmem:[%s1798_s2] ss:$0 sm:$0xff]  ;;  %v146_v27 = vpop.xlane.xlu0 %145 }
 0x134   :  { %1206 = vrsqrt.f32 %v182_v3  ;;  %v168_v7 = vmul.f32 0.0078125, %v144_v5  ;;  %v169_v35 = vmul.f32 0.0078125, %v146_v27 }
 0x135   :  { %1208 = vrsqrt.f32 %v181_v2  ;;  %v232_v18 = vmul.f32 %v1571_v8, %v209_v6 }
 0x136   :  { %v1201_v11 = vpop.eup %1200  ;;  %v184_v12 = vadd.f32 1e-05, %v168_v7  ;;  %v185_v43 = vadd.f32 1e-05, %v169_v35 }
 0x137   :  { %v210_v17 = vmul.f32 %v1201_v11, %v1449_v30  ;;  %v1203_v19 = vpop.eup %1202  ;;  %v148_v20 = vpop.xlane.xlu1 %147  ;;  %v255_v14 = vadd.f32 %v1578_v23, %v232_v18 }
 0x138   :  { %v211_v30 = vmul.f32 %v1203_v19, %v1445_v24  ;;  %1210 = vrsqrt.f32 %v184_v12  ;;  %v170_v29 = vmul.f32 0.0078125, %v148_v20  ;;  %v150_v44 = vpop.xlane.xlu0 %149 }
 0x139   :  { %v233_v21 = vmul.f32 %v1571_v8, %v210_v17  ;;  %1212 = vrsqrt.f32 %v183_v26  ;;  %v171_v53 = vmul.f32 0.0078125, %v150_v44 }
 0x13a   :  { %v1205_v25 = vpop.eup %1204  ;;  %v234_v37 = vmul.f32 %v1571_v8, %v211_v30  ;;  %v186_v41 = vadd.f32 1e-05, %v170_v29 }
 0x13b   :  { %v256_v15 = vadd.f32 %v1578_v23, %v233_v21  ;;  %v212_v28 = vmul.f32 %v1205_v25, %v1451_v31  ;;  %v152_v42 = vpop.xlane.xlu1 %151  ;;  %v187_v60 = vadd.f32 1e-05, %v171_v53 }
 0x13c   :  { %v257_v45 = vadd.f32 %v1578_v23, %v234_v37  ;;  %1214 = vrsqrt.f32 %v186_v41  ;;  %v172_v49 = vmul.f32 0.0078125, %v152_v42  ;;  %v154_v61 = vpop.xlane.xlu0 %153 }
 0x13d   :  { %v271_v32 = vpack.c.bf16 %v256_v15, %v255_v14  ;;  %v235_v33 = vmul.f32 %v1571_v8, %v212_v28  ;;  %1216 = vrsqrt.f32 %v185_v43  ;;  %v173_v6 = vmul.f32 0.0078125, %v154_v61  ;;  %v1195_v61 = vld [vmem:[%s1801_s5 + $0x30] sm:$0xff]  }
 0x13e   :  { %v1207_v34 = vpop.eup %1206  ;;  %v188_v58 = vadd.f32 1e-05, %v172_v49 }
 0x13f   :  { %452 = vmatmul.mubr.bf16.vlgmr.msra.gmra.mrb[0].mxu0 %v271_v32  ;;  %v1209_v40 = vpop.eup %1208  ;;  %v258_v24 = vadd.f32 %v1578_v23, %v235_v33  ;;  %v214_v31 = vmul.f32 %v1207_v34, %v1459_v39  ;;  %v156_v39 = vpop.xlane.xlu1 %155  ;;  %v189_v18 = vadd.f32 1e-05, %v173_v6 }
 0x140   :  { %461 = vmatprep.mubr.bf16.mxu0 %v1318_v36  ;;  %v213_v48 = vmul.f32 %v1209_v40, %v1457_v38  ;;  %1218 = vrsqrt.f32 %v188_v58  ;;  %v174_v2 = vmul.f32 0.0078125, %v156_v39  ;;  %v158_v19 = vpop.xlane.xlu0 %157  ;;  %v1191_v39 = vld [vmem:[%s1801_s5 + $0x20] sm:$0xff]  }
 0x141   :  { %v272_v50 = vpack.c.bf16 %v258_v24, %v257_v45  ;;  %v237_v51 = vmul.f32 %v1571_v8, %v214_v31  ;;  %1220 = vrsqrt.f32 %v187_v60  ;;  %v175_v14 = vmul.f32 0.0078125, %v158_v19  ;;  %v1194_v60 = vld [vmem:[%s1801_s5 + $0x70] sm:$0xff]  }
 0x142   :  { %v1211_v52 = vpop.eup %1210  ;;  %v236_v56 = vmul.f32 %v1571_v8, %v213_v48  ;;  %v190_v16 = vadd.f32 1e-05, %v174_v2  ;;  %v329_v2 = vlaneseq }
 0x143   :  { %v1213_v57 = vpop.eup %1212  ;;  %v260_v59 = vadd.f32 %v1578_v23, %v237_v51  ;;  %v216_v38 = vmul.f32 %v1211_v52, %v1467_v47  ;;  %v160_v47 = vpop.xlane.xlu1 %159 }
 0x144   :  { %v259_v62 = vadd.f32 %v1578_v23, %v236_v56  ;;  %v215_v63 = vmul.f32 %v1213_v57, %v1465_v46  ;;  %1222 = vrsqrt.f32 %v190_v16  ;;  %v176_v21 = vmul.f32 0.0078125, %v160_v47 }
 0x145   :  { %v239_v4 = vmul.f32 %v1571_v8, %v216_v38  ;;  %1224 = vrsqrt.f32 %v189_v18  ;;  %v1193_v38 = vld [vmem:[%s1801_s5 + $0x28] sm:$0xff]  }
 0x146   :  { %v273_v3 = vpack.c.bf16 %v260_v59, %v259_v62  ;;  %v1215_v5 = vpop.eup %1214  ;;  %v238_v7 = vmul.f32 %v1571_v8, %v215_v63  ;;  %v192_v28 = vadd.f32 1e-05, %v176_v21  ;;  %v1192_v59 = vld [vmem:[%s1801_s5 + $0x68] sm:$0xff]   ;;  %v1196_v62 = vld [vmem:[%s1801_s5 + $0x78] sm:$0xff]  }
 0x147   :  { %462 = vmatmul.mubr.bf16.gmra.mrb[4].mxu0 %v272_v50  ;;  %v1217_v11 = vpop.eup %1216  ;;  %v262_v17 = vadd.f32 %v1578_v23, %v239_v4  ;;  %v218_v46 = vmul.f32 %v1215_v5, %v1477_v55  ;;  %v1197_v63 = vld [vmem:[%s1801_s5 + $0x38] sm:$0xff]   ;;  %v327_v5 = vld [vmem:[%s1800_s4] sm:$0x3] }
 0x148   :  { %471 = vmatprep.mubr.bf16.mxu0 %v1318_v36  ;;  %v261_v12 = vadd.f32 %v1578_v23, %v238_v7  ;;  %v217_v20 = vmul.f32 %v1217_v11, %v1474_v54  ;;  %v191_v54 = vadd.f32 1e-05, %v175_v14  ;;  %1226 = vrsqrt.f32 %v192_v28 }
 0x149   :  { %v241_v26 = vmul.f32 %v1571_v8, %v218_v46 }
 0x14a   :  { %v274_v25 = vpack.c.bf16 %v262_v17, %v261_v12  ;;  %v1219_v27 = vpop.eup %1218  ;;  %v240_v15 = vmul.f32 %v1571_v8, %v217_v20  ;;  %1228 = vrsqrt.f32 %v191_v54 }
 0x14b   :  { %v1221_v30 = vpop.eup %1220  ;;  %v264_v55 = vadd.f32 %v1578_v23, %v241_v26  ;;  %v220_v29 = vmul.f32 %v1219_v27, %v1493_v1 }
 0x14c   :  { %v263_v32 = vadd.f32 %v1578_v23, %v240_v15  ;;  %v219_v33 = vmul.f32 %v1221_v30, %v1490_v0 }
 0x14d   :  { %v243_v35 = vmul.f32 %v1571_v8, %v220_v29 }
 0x14e   :  { %v275_v34 = vpack.c.bf16 %v264_v55, %v263_v32  ;;  %v1223_v37 = vpop.eup %1222  ;;  %v242_v40 = vmul.f32 %v1571_v8, %v219_v33 }
 0x14f   :  { %472 = vmatmul.mubr.bf16.gmra.mrb[8].mxu0 %v273_v3  ;;  %v1225_v41 = vpop.eup %1224  ;;  %v266_v42 = vadd.f32 %v1578_v23, %v243_v35  ;;  %v222_v1 = vmul.f32 %v1223_v37, %v1506_v10  ;;  %v330_v3 = vshrl.u32 %v329_v2, 7 }
 0x150   :  { %481 = vmatprep.mubr.bf16.mxu0 %v1318_v36  ;;  %v265_v24 = vadd.f32 %v1578_v23, %v242_v40  ;;  %v221_v0 = vmul.f32 %v1225_v41, %v1503_v9 }
 0x151   :  { %v245_v43 = vmul.f32 %v1571_v8, %v222_v1  ;;  %v331_v4 = vsub.s32 0, %v330_v3  ;;  %v335_v6 = vsub.s32 1, %v330_v3 }
 0x152   :  { %v276_v31 = vpack.c.bf16 %v266_v42, %v265_v24  ;;  %v1227_v44 = vpop.eup %1226  ;;  %v244_v45 = vmul.f32 %v1571_v8, %v221_v0 }
 0x153   :  { %v268_v49 = vadd.f32 %v1578_v23, %v245_v43  ;;  %v224_v50 = vmul.f32 %v1227_v44, %v1522_v22  ;;  %v1186_v22 = vld [vmem:[%s1801_s5 + $0x50] sm:$0xff]   ;;  %v1671_v7 = vrot.slane %v327_v5, %v331_v4  ;;  %v1673_v11 = vrot.slane %v327_v5, %v335_v6 }
 0x154   :  { %v1229_v48 = vpop.eup %1228  ;;  %v267_v10 = vadd.f32 %v1578_v23, %v244_v45  ;;  %1094 = vmatprep.subr.bf16.mxu1 %v1186_v22 }
 0x155   :  { %v223_v51 = vmul.f32 %v1229_v48, %v1519_v13  ;;  %v247_v9 = vmul.f32 %v1571_v8, %v224_v50  ;;  %v1187_v13 = vld [vmem:[%s1801_s5 + $0x10] sm:$0xff]  }
 0x156   :  { %v277_v52 = vpack.c.bf16 %v268_v49, %v267_v10  ;;  %1095 = vmatpush3.bf16.msra.mxu1 %v1187_v13 }
 0x157   :  { %482 = vmatmul.mubr.bf16.gmra.mrb[12].mxu0 %v274_v25  ;;  %v246_v53 = vmul.f32 %v1571_v8, %v223_v51  ;;  %v270_v56 = vadd.f32 %v1578_v23, %v247_v9  ;;  %v1189_v8 = vld [vmem:[%s1801_s5 + $0x18] sm:$0xff]  }
 0x158   :  { %491 = vmatprep.mubr.bf16.mxu0 %v1318_v36 }
 0x159   :  { %v269_v57 = vadd.f32 %v1578_v23, %v246_v53  ;;  %v1190_v23 = vld [vmem:[%s1801_s5 + $0x60] sm:$0xff]  }
 0x15b   :  { %v278_v58 = vpack.c.bf16 %v270_v56, %v269_v57 }
 0x15f   :  { %492 = vmatmul.mubr.bf16.gmra.mrb[16].mxu0 %v275_v34 }
 0x160   :  { %501 = vmatprep.mubr.bf16.mxu0 %v1318_v36 }
 0x167   :  { %502 = vmatmul.mubr.bf16.gmra.mrb[20].mxu0 %v276_v31 }
 0x168   :  { %511 = vmatprep.mubr.bf16.mxu0 %v1318_v36 }
 0x16f   :  { %512 = vmatmul.mubr.bf16.gmra.mrb[24].mxu0 %v277_v52 }
 0x170   :  { %521 = vmatprep.mubr.bf16.mxu0 %v1318_v36  ;;  %v1188_v36 = vld [vmem:[%s1801_s5 + $0x58] sm:$0xff]  }
 0x171   :  { %1096 = vmatprep.subr.bf16.mxu1 %v1188_v36 }
 0x172   :  { %1097 = vmatpush3.bf16.msra.mxu1 %v1189_v8 }
 0x173   :  { %1098 = vmatprep.subr.bf16.mxu1 %v1190_v23 }
 0x176   :  { %1099 = vmatpush3.bf16.msra.mxu1 %v1191_v39 }
 0x177   :  { %522 = vmatmul.mubr.bf16.gmra.mrb[28].mxu0 %v278_v58  ;;  %1100 = vmatprep.subr.bf16.mxu1 %v1192_v59 }
 0x17a   :  { %1101 = vmatpush3.bf16.msra.mxu1 %v1193_v38 }
 0x17b   :  { %1102 = vmatprep.subr.bf16.mxu1 %v1194_v60 }
 0x17e   :  { %1103 = vmatpush3.bf16.msra.mxu1 %v1195_v61 }
 0x17f   :  { %1104 = vmatprep.subr.bf16.mxu1 %v1196_v62 }
 0x182   :  { %1105 = vmatpush3.bf16.msra.mxu1 %v1197_v63 }
 0x212   :  { %v453_v16 = vpop.f32.mrb[0].mxu0 }
 0x213   :  { %v454_v47 = vadd.f32 %v453_v16, %v1671_v7  ;;  %v455_v17 = vpop.f32.mrb[1].mxu0 }
 0x214   :  { %v456_v46 = vadd.f32 %v455_v17, %v1673_v11  ;;  %v457_v18 = vpop.f32.mrb[2].mxu0 }
 0x215   :  { %v564_v19 = vmul.f32 0.70710677, %v454_v47  ;;  %v458_v12 = vadd.f32 %v457_v18, %v1671_v7  ;;  %v459_v20 = vpop.f32.mrb[3].mxu0  ;;  %v532_v24 = vmul.f32 0.5, %v454_v47 }
 0x216   :  { %v565_v21 = vmul.f32 0.70710677, %v456_v46  ;;  %v460_v25 = vadd.f32 %v459_v20, %v1673_v11  ;;  %v533_v51 = vmul.f32 0.5, %v456_v46 }
 0x217   :  { %1230 = verf.f32 %v564_v19  ;;  %v566_v26 = vmul.f32 0.70710677, %v458_v12  ;;  %v534_v45 = vmul.f32 0.5, %v458_v12 }
 0x218   :  { %1232 = verf.f32 %v565_v21  ;;  %v567_v27 = vmul.f32 0.70710677, %v460_v25  ;;  %v535_v58 = vmul.f32 0.5, %v460_v25 }
 0x219   :  { %1234 = verf.f32 %v566_v26 }
 0x21a   :  { %1236 = verf.f32 %v567_v27  ;;  %v463_v14 = vpop.f32.mrb[4].mxu0 }
 0x21b   :  { %v464_v15 = vadd.f32 %v463_v14, %v1671_v7  ;;  %v465_v30 = vpop.f32.mrb[5].mxu0 }
 0x21c   :  { %v466_v28 = vadd.f32 %v465_v30, %v1673_v11  ;;  %v467_v55 = vpop.f32.mrb[6].mxu0 }
 0x21d   :  { %v568_v29 = vmul.f32 0.70710677, %v464_v15  ;;  %v468_v54 = vadd.f32 %v467_v55, %v1671_v7  ;;  %v469_v32 = vpop.f32.mrb[7].mxu0  ;;  %v536_v47 = vmul.f32 0.5, %v464_v15 }
 0x21e   :  { %v569_v33 = vmul.f32 0.70710677, %v466_v28  ;;  %v470_v34 = vadd.f32 %v469_v32, %v1673_v11  ;;  %v537_v12 = vmul.f32 0.5, %v466_v28 }
 0x21f   :  { %1238 = verf.f32 %v568_v29  ;;  %v570_v35 = vmul.f32 0.70710677, %v468_v54  ;;  %v538_v17 = vmul.f32 0.5, %v468_v54 }
 0x220   :  { %1240 = verf.f32 %v569_v33  ;;  %v571_v37 = vmul.f32 0.70710677, %v470_v34  ;;  %v539_v20 = vmul.f32 0.5, %v470_v34 }
 0x221   :  { %v1231_v40 = vpop.eup %1230  ;;  %1242 = verf.f32 %v570_v35 }
 0x222   :  { %v1233_v41 = vpop.eup %1232  ;;  %1244 = verf.f32 %v571_v37  ;;  %v473_v42 = vpop.f32.mrb[8].mxu0  ;;  %v628_v0 = vadd.f32 1.0, %v1231_v40 }
 0x223   :  { %v1235_v1 = vpop.eup %1234  ;;  %v1684_v31 = vadd.f32 %v473_v42, %v1671_v7  ;;  %v475_v43 = vpop.f32.mrb[9].mxu0  ;;  %v629_v10 = vadd.f32 1.0, %v1233_v41 }
 0x224   :  { %v1237_v44 = vpop.eup %1236  ;;  %v630_v48 = vadd.f32 1.0, %v1235_v1  ;;  %v1687_v49 = vadd.f32 %v475_v43, %v1673_v11  ;;  %v477_v50 = vpop.f32.mrb[10].mxu0  ;;  %v660_v36 = vmul.f32 %v628_v0, %v532_v24 }
 0x225   :  { %v572_v52 = vmul.f32 0.70710677, %v1684_v31  ;;  %v1691_v9 = vadd.f32 %v477_v50, %v1671_v7  ;;  %v479_v53 = vpop.f32.mrb[11].mxu0  ;;  %v631_v56 = vadd.f32 1.0, %v1237_v44  ;;  %v661_v39 = vmul.f32 %v629_v10, %v533_v51 }
 0x226   :  { %v662_v57 = vmul.f32 %v630_v48, %v534_v45  ;;  %v573_v22 = vmul.f32 0.70710677, %v1687_v49  ;;  %v1695_v13 = vadd.f32 %v479_v53, %v1673_v11  ;;  %v540_v44 = vmul.f32 0.5, %v1684_v31 }
 0x227   :  { %1246 = verf.f32 %v572_v52  ;;  %v574_v8 = vmul.f32 0.70710677, %v1691_v9  ;;  %v663_v59 = vmul.f32 %v631_v56, %v535_v58  ;;  %v542_v45 = vmul.f32 0.5, %v1691_v9 }
 0x228   :  { %1248 = verf.f32 %v573_v22  ;;  %v575_v23 = vmul.f32 0.70710677, %v1695_v13  ;;  %v708_v60 = vpack.c.bf16 %v662_v57, %v660_v36  ;;  %v541_v51 = vmul.f32 0.5, %v1687_v49 }
 0x229   :  { %v1239_v38 = vpop.eup %1238  ;;  %1250 = verf.f32 %v574_v8  ;;  %v709_v2 = vpack.c.bf16 %v663_v59, %v661_v39  ;;  %v543_v52 = vmul.f32 0.5, %v1695_v13 }
 0x22a   :  { %v1241_v61 = vpop.eup %1240  ;;  %v632_v62 = vadd.f32 1.0, %v1239_v38  ;;  %1252 = verf.f32 %v575_v23  ;;  %v483_v63 = vpop.f32.mrb[12].mxu0 }
 0x22b   :  { %v1243_v3 = vpop.eup %1242  ;;  %v633_v4 = vadd.f32 1.0, %v1241_v61  ;;  %v1700_v5 = vadd.f32 %v483_v63, %v1671_v7  ;;  %v485_v6 = vpop.f32.mrb[13].mxu0  ;;  %884 = vmatprep.mubr.bf16.mxu1 %v709_v2 }
 0x22c   :  { %v1245_v16 = vpop.eup %1244  ;;  %v634_v46 = vadd.f32 1.0, %v1243_v3  ;;  %v1703_v18 = vadd.f32 %v485_v6, %v1673_v11  ;;  %v487_v19 = vpop.f32.mrb[14].mxu0  ;;  %885 = vmatmul.mubr.bf16.vlgmr.msra.gmra.mrb[0].mxu1 %v708_v60  ;;  %v664_v27 = vmul.f32 %v632_v62, %v536_v47 }
 0x22d   :  { %v635_v21 = vadd.f32 1.0, %v1245_v16  ;;  %v576_v25 = vmul.f32 0.70710677, %v1700_v5  ;;  %v489_v26 = vpop.f32.mrb[15].mxu0  ;;  %v488_v15 = vadd.f32 %v487_v19, %v1671_v7  ;;  %v665_v55 = vmul.f32 %v633_v4, %v537_v12 }
 0x22e   :  { %v666_v14 = vmul.f32 %v634_v46, %v538_v17  ;;  %v577_v30 = vmul.f32 0.70710677, %v1703_v18  ;;  %v490_v54 = vadd.f32 %v489_v26, %v1673_v11  ;;  %v544_v4 = vmul.f32 0.5, %v1700_v5 }
 0x22f   :  { %v667_v29 = vmul.f32 %v635_v21, %v539_v20  ;;  %1254 = verf.f32 %v576_v25  ;;  %v578_v32 = vmul.f32 0.70710677, %v488_v15  ;;  %v545_v46 = vmul.f32 0.5, %v1703_v18 }
 0x230   :  { %1256 = verf.f32 %v577_v30  ;;  %v710_v28 = vpack.c.bf16 %v666_v14, %v664_v27  ;;  %v579_v34 = vmul.f32 0.70710677, %v490_v54  ;;  %v546_v19 = vmul.f32 0.5, %v488_v15 }
 0x231   :  { %v1247_v33 = vpop.eup %1246  ;;  %v711_v35 = vpack.c.bf16 %v667_v29, %v665_v55  ;;  %1258 = verf.f32 %v578_v32  ;;  %v547_v25 = vmul.f32 0.5, %v490_v54 }
 0x232   :  { %v1249_v37 = vpop.eup %1248  ;;  %v636_v40 = vadd.f32 1.0, %v1247_v33  ;;  %v493_v41 = vpop.f32.mrb[16].mxu0  ;;  %1260 = verf.f32 %v579_v34 }
 0x233   :  { %v1251_v42 = vpop.eup %1250  ;;  %v637_v1 = vadd.f32 1.0, %v1249_v37  ;;  %v1710_v24 = vadd.f32 %v493_v41, %v1671_v7  ;;  %v495_v0 = vpop.f32.mrb[17].mxu0  ;;  %892 = vmatprep.mubr.bf16.mxu1 %v711_v35 }
 0x234   :  { %v1253_v43 = vpop.eup %1252  ;;  %v638_v48 = vadd.f32 1.0, %v1251_v42  ;;  %v1715_v50 = vadd.f32 %v495_v0, %v1673_v11  ;;  %v497_v10 = vpop.f32.mrb[18].mxu0  ;;  %893 = vmatmul.mubr.bf16.gmra.mrb[4].mxu1 %v710_v28  ;;  %v668_v58 = vmul.f32 %v636_v40, %v540_v44 }
 0x235   :  { %v639_v53 = vadd.f32 1.0, %v1253_v43  ;;  %v580_v56 = vmul.f32 0.70710677, %v1710_v24  ;;  %v499_v57 = vpop.f32.mrb[19].mxu0  ;;  %v498_v9 = vadd.f32 %v497_v10, %v1671_v7  ;;  %v669_v36 = vmul.f32 %v637_v1, %v541_v51 }
 0x236   :  { %v670_v22 = vmul.f32 %v638_v48, %v542_v45  ;;  %v581_v31 = vmul.f32 0.70710677, %v1715_v50  ;;  %v500_v23 = vadd.f32 %v499_v57, %v1673_v11  ;;  %v548_v1 = vmul.f32 0.5, %v1710_v24 }
 0x237   :  { %v671_v8 = vmul.f32 %v639_v53, %v543_v52  ;;  %1262 = verf.f32 %v580_v56  ;;  %v582_v49 = vmul.f32 0.70710677, %v498_v9  ;;  %v549_v48 = vmul.f32 0.5, %v1715_v50 }
 0x238   :  { %1264 = verf.f32 %v581_v31  ;;  %v712_v39 = vpack.c.bf16 %v670_v22, %v668_v58  ;;  %v583_v59 = vmul.f32 0.70710677, %v500_v23  ;;  %v550_v10 = vmul.f32 0.5, %v498_v9 }
 0x239   :  { %v1255_v13 = vpop.eup %1254  ;;  %v713_v38 = vpack.c.bf16 %v671_v8, %v669_v36  ;;  %1266 = verf.f32 %v582_v49  ;;  %v551_v56 = vmul.f32 0.5, %v500_v23 }
 0x23a   :  { %v1257_v60 = vpop.eup %1256  ;;  %v503_v61 = vpop.f32.mrb[20].mxu0  ;;  %v640_v62 = vadd.f32 1.0, %v1255_v13  ;;  %1268 = verf.f32 %v583_v59 }
 0x23b   :  { %v1724_v63 = vadd.f32 %v503_v61, %v1671_v7  ;;  %v505_v2 = vpop.f32.mrb[21].mxu0  ;;  %900 = vmatprep.mubr.bf16.mxu1 %v713_v38  ;;  %v1259_v3 = vpop.eup %1258  ;;  %v641_v6 = vadd.f32 1.0, %v1257_v60 }
 0x23c   :  { %v1728_v16 = vadd.f32 %v505_v2, %v1673_v11  ;;  %v507_v47 = vpop.f32.mrb[22].mxu0  ;;  %v1261_v17 = vpop.eup %1260  ;;  %v642_v12 = vadd.f32 1.0, %v1259_v3  ;;  %901 = vmatmul.mubr.bf16.gmra.mrb[8].mxu1 %v712_v39  ;;  %v672_v14 = vmul.f32 %v640_v62, %v544_v4 }
 0x23d   :  { %v584_v20 = vmul.f32 0.70710677, %v1724_v63  ;;  %v509_v21 = vpop.f32.mrb[23].mxu0  ;;  %v643_v26 = vadd.f32 1.0, %v1261_v17  ;;  %v1734_v5 = vadd.f32 %v507_v47, %v1671_v7  ;;  %v673_v18 = vmul.f32 %v641_v6, %v545_v46 }
 0x23e   :  { %v585_v27 = vmul.f32 0.70710677, %v1728_v16  ;;  %v674_v30 = vmul.f32 %v642_v12, %v546_v19  ;;  %v1737_v55 = vadd.f32 %v509_v21, %v1673_v11  ;;  %v552_v3 = vmul.f32 0.5, %v1724_v63 }
 0x23f   :  { %1270 = verf.f32 %v584_v20  ;;  %v675_v15 = vmul.f32 %v643_v26, %v547_v25  ;;  %v586_v29 = vmul.f32 0.70710677, %v1734_v5  ;;  %v553_v46 = vmul.f32 0.5, %v1728_v16 }
 0x240   :  { %1272 = verf.f32 %v585_v27  ;;  %v587_v54 = vmul.f32 0.70710677, %v1737_v55  ;;  %v714_v28 = vpack.c.bf16 %v674_v30, %v672_v14  ;;  %v554_v19 = vmul.f32 0.5, %v1734_v5 }
 0x241   :  { %v1263_v32 = vpop.eup %1262  ;;  %1274 = verf.f32 %v586_v29  ;;  %v715_v35 = vpack.c.bf16 %v675_v15, %v673_v18  ;;  %v555_v25 = vmul.f32 0.5, %v1737_v55 }
 0x242   :  { %v1265_v33 = vpop.eup %1264  ;;  %v513_v34 = vpop.f32.mrb[24].mxu0  ;;  %v644_v37 = vadd.f32 1.0, %v1263_v32  ;;  %1276 = verf.f32 %v587_v54 }
 0x243   :  { %v1742_v40 = vadd.f32 %v513_v34, %v1671_v7  ;;  %v515_v41 = vpop.f32.mrb[25].mxu0  ;;  %v1267_v42 = vpop.eup %1266  ;;  %v645_v0 = vadd.f32 1.0, %v1265_v33  ;;  %908 = vmatprep.mubr.bf16.mxu1 %v715_v35 }
 0x244   :  { %v1746_v43 = vadd.f32 %v515_v41, %v1673_v11  ;;  %v517_v44 = vpop.f32.mrb[26].mxu0  ;;  %v1269_v45 = vpop.eup %1268  ;;  %v646_v51 = vadd.f32 1.0, %v1267_v42  ;;  %909 = vmatmul.mubr.bf16.gmra.mrb[12].mxu1 %v714_v28  ;;  %v676_v22 = vmul.f32 %v644_v37, %v548_v1 }
 0x245   :  { %v588_v52 = vmul.f32 0.70710677, %v1742_v40  ;;  %v519_v53 = vpop.f32.mrb[27].mxu0  ;;  %v647_v57 = vadd.f32 1.0, %v1269_v45  ;;  %v518_v24 = vadd.f32 %v517_v44, %v1671_v7  ;;  %v677_v8 = vmul.f32 %v645_v0, %v549_v48 }
 0x246   :  { %v589_v58 = vmul.f32 0.70710677, %v1746_v43  ;;  %v678_v31 = vmul.f32 %v646_v51, %v550_v10  ;;  %v520_v36 = vadd.f32 %v519_v53, %v1673_v11  ;;  %v556_v37 = vmul.f32 0.5, %v1742_v40 }
 0x247   :  { %1278 = verf.f32 %v588_v52  ;;  %v679_v49 = vmul.f32 %v647_v57, %v551_v56  ;;  %v590_v50 = vmul.f32 0.70710677, %v518_v24  ;;  %v558_v41 = vmul.f32 0.5, %v518_v24 }
 0x248   :  { %1280 = verf.f32 %v589_v58  ;;  %v591_v39 = vmul.f32 0.70710677, %v520_v36  ;;  %v716_v13 = vpack.c.bf16 %v678_v31, %v676_v22  ;;  %v557_v42 = vmul.f32 0.5, %v1746_v43 }
 0x249   :  { %v1271_v9 = vpop.eup %1270  ;;  %1282 = verf.f32 %v590_v50  ;;  %v717_v38 = vpack.c.bf16 %v679_v49, %v677_v8  ;;  %v559_v1 = vmul.f32 0.5, %v520_v36 }
 0x24a   :  { %v1273_v59 = vpop.eup %1272  ;;  %v523_v23 = vpop.f32.mrb[28].mxu0  ;;  %v648_v60 = vadd.f32 1.0, %v1271_v9  ;;  %1284 = verf.f32 %v591_v39 }
 0x24b   :  { %v524_v61 = vadd.f32 %v523_v23, %v1671_v7  ;;  %v525_v62 = vpop.f32.mrb[29].mxu0  ;;  %v1275_v2 = vpop.eup %1274  ;;  %v649_v4 = vadd.f32 1.0, %v1273_v59  ;;  %916 = vmatprep.mubr.bf16.mxu1 %v717_v38 }
 0x24c   :  { %v526_v6 = vadd.f32 %v525_v62, %v1673_v11  ;;  %v527_v47 = vpop.f32.mrb[30].mxu0  ;;  %v1277_v17 = vpop.eup %1276  ;;  %v650_v12 = vadd.f32 1.0, %v1275_v2  ;;  %917 = vmatmul.mubr.bf16.gmra.mrb[16].mxu1 %v716_v13  ;;  %v680_v14 = vmul.f32 %v648_v60, %v552_v3 }
 0x24d   :  { %v592_v20 = vmul.f32 0.70710677, %v524_v61  ;;  %v529_v21 = vpop.f32.mrb[31].mxu0  ;;  %v651_v26 = vadd.f32 1.0, %v1277_v17  ;;  %v528_v63 = vadd.f32 %v527_v47, %v1671_v7  ;;  %v681_v15 = vmul.f32 %v649_v4, %v553_v46 }
 0x24e   :  { %v593_v27 = vmul.f32 0.70710677, %v526_v6  ;;  %v682_v30 = vmul.f32 %v650_v12, %v554_v19  ;;  %v530_v18 = vadd.f32 %v529_v21, %v1673_v11  ;;  %v560_v24 = vmul.f32 0.5, %v524_v61  ;;  %v1766_v61 = vld [vmem:[%s1802_s6] ss:$0 sm:$0xff]  ;;  %s1319_s6 = smov [#allocation4]  }
 0x24f   :  { %1286 = verf.f32 %v592_v20  ;;  %v683_v29 = vmul.f32 %v651_v26, %v555_v25  ;;  %v594_v16 = vmul.f32 0.70710677, %v528_v63  ;;  %v562_v31 = vmul.f32 0.5, %v528_v63  ;;  %s1044_s27 = sshll.u32 %s1319_s6, 4  ;;  %s1045_s27 = int_to_ptr.vmem [resolvable:$true] %s1044_s27 }
 0x250   :  { %1288 = verf.f32 %v593_v27  ;;  %v595_v32 = vmul.f32 0.70710677, %v530_v18  ;;  %v718_v54 = vpack.c.bf16 %v682_v30, %v680_v14  ;;  %v561_v43 = vmul.f32 0.5, %v526_v6  ;;  %s1294_s1 = scalar_lea.vmem %s1045_s27, 2048  ;;  %p1299_p1 = scmp.lt.s32.totalorder %s1045_s27, %s1045_s27 }
 0x251   :  { %v1279_v5 = vpop.eup %1278  ;;  %1290 = verf.f32 %v594_v16  ;;  %v719_v33 = vpack.c.bf16 %v683_v29, %v681_v15  ;;  %v563_v36 = vmul.f32 0.5, %v530_v18  ;;  %p1295_p0 = scmp.ne.s32.totalorder %s1045_s27, %s1294_s1  ;;  %p1300_p2 = scmp.lt.s32.totalorder %s1294_s1, %s1294_s1 }
 0x252   :  { %v1281_v28 = vpop.eup %1280  ;;  %v652_v55 = vadd.f32 1.0, %v1279_v5  ;;  %1292 = verf.f32 %v595_v32 }
 0x253   :  { %v1283_v34 = vpop.eup %1282  ;;  %v653_v35 = vadd.f32 1.0, %v1281_v28  ;;  %924 = vmatprep.mubr.bf16.mxu1 %v719_v33  ;;  %p1301_p3 = por %p1300_p2, %p1299_p1 }
 0x254   :  { %v1285_v7 = vpop.eup %1284  ;;  %v654_v11 = vadd.f32 1.0, %v1283_v34  ;;  %925 = vmatmul.mubr.bf16.gmra.mrb[20].mxu1 %v718_v54  ;;  %v684_v44 = vmul.f32 %v652_v55, %v556_v37 }
 0x255   :  { %v655_v0 = vadd.f32 1.0, %v1285_v7  ;;  %v685_v48 = vmul.f32 %v653_v35, %v557_v42  ;;  %p1302_p4 = pnand %p1301_p3, %p1295_p0 }
 0x256   :  { %v686_v45 = vmul.f32 %v654_v11, %v558_v41 }
 0x257   :  { %v687_v10 = vmul.f32 %v655_v0, %v559_v1 }
 0x258   :  { %v720_v52 = vpack.c.bf16 %v686_v45, %v684_v44 }
 0x259   :  { %v1287_v51 = vpop.eup %1286  ;;  %v721_v56 = vpack.c.bf16 %v687_v10, %v685_v48 }
 0x25a   :  { %v1289_v53 = vpop.eup %1288  ;;  %v656_v57 = vadd.f32 1.0, %v1287_v51 }
 0x25b   :  { %v1291_v58 = vpop.eup %1290  ;;  %v657_v22 = vadd.f32 1.0, %v1289_v53  ;;  %932 = vmatprep.mubr.bf16.mxu1 %v721_v56 }
 0x25c   :  { %v1293_v40 = vpop.eup %1292  ;;  %v658_v8 = vadd.f32 1.0, %v1291_v58  ;;  %933 = vmatmul.mubr.bf16.gmra.mrb[24].mxu1 %v720_v52  ;;  %v688_v50 = vmul.f32 %v656_v57, %v560_v24 }
 0x25d   :  { %v659_v49 = vadd.f32 1.0, %v1293_v40  ;;  %v689_v39 = vmul.f32 %v657_v22, %v561_v43 }
 0x25e   :  { %v690_v9 = vmul.f32 %v658_v8, %v562_v31 }
 0x25f   :  { %v691_v13 = vmul.f32 %v659_v49, %v563_v36 }
 0x260   :  { %v722_v59 = vpack.c.bf16 %v690_v9, %v688_v50 }
 0x261   :  { %v723_v23 = vpack.c.bf16 %v691_v13, %v689_v39 }
 0x263   :  { %940 = vmatprep.mubr.bf16.mxu1 %v723_v23 }
 0x264   :  { %941 = vmatmul.mubr.bf16.gmra.mrb[28].mxu1 %v722_v59 }
 0x2ff   :  { %v1106_v38 = vpop.f32.mrb[0].mxu1 }
 0x300   :  { %v1107_v60 = vpop.f32.mrb[1].mxu1 }
 0x301   :  { %v1108_v62 = vadd.f32 %v1107_v60, %v1106_v38  ;;  %v1109_v2 = vpop.f32.mrb[2].mxu1 }
 0x302   :  { %v1110_v3 = vpop.f32.mrb[3].mxu1 }
 0x303   :  { %v1007_v4 = vadd.f32 %v1108_v62, %v1766_v61  ;;  %v1111_v6 = vadd.f32 %v1110_v3, %v1109_v2 }
 0x305   :  { %1023 = vst [vmem:[#allocation4] sm:$0xff] %v1007_v4  ;;  %v1008_v47 = vadd.f32 %v1111_v6, %v1766_v61 }
 0x307   :  { %1024 = vst [vmem:[#allocation4 + $0x8] sm:$0xff] %v1008_v47  ;;  %v1112_v17 = vpop.f32.mrb[4].mxu1 }
 0x308   :  { %v1113_v46 = vpop.f32.mrb[5].mxu1 }
 0x309   :  { %v1114_v19 = vadd.f32 %v1113_v46, %v1112_v17  ;;  %v1115_v12 = vpop.f32.mrb[6].mxu1 }
 0x30a   :  { %v1116_v20 = vpop.f32.mrb[7].mxu1 }
 0x30b   :  { %v1009_v21 = vadd.f32 %v1114_v19, %v1766_v61  ;;  %v1117_v25 = vadd.f32 %v1116_v20, %v1115_v12 }
 0x30d   :  { %1025 = vst [vmem:[#allocation4 + $0x10] sm:$0xff] %v1009_v21  ;;  %v1010_v26 = vadd.f32 %v1117_v25, %v1766_v61 }
 0x30f   :  { %1026 = vst [vmem:[#allocation4 + $0x18] sm:$0xff] %v1010_v26  ;;  %v1118_v27 = vpop.f32.mrb[8].mxu1 }
 0x310   :  { %v1119_v63 = vpop.f32.mrb[9].mxu1 }
 0x311   :  { %v1120_v14 = vadd.f32 %v1119_v63, %v1118_v27  ;;  %v1121_v30 = vpop.f32.mrb[10].mxu1 }
 0x312   :  { %v1122_v18 = vpop.f32.mrb[11].mxu1 }
 0x313   :  { %v1011_v15 = vadd.f32 %v1120_v14, %v1766_v61  ;;  %v1123_v29 = vadd.f32 %v1122_v18, %v1121_v30 }
 0x315   :  { %1027 = vst [vmem:[#allocation4 + $0x20] sm:$0xff] %v1011_v15  ;;  %v1012_v16 = vadd.f32 %v1123_v29, %v1766_v61 }
 0x317   :  { %1028 = vst [vmem:[#allocation4 + $0x28] sm:$0xff] %v1012_v16  ;;  %v1124_v5 = vpop.f32.mrb[12].mxu1 }
 0x318   :  { %v1125_v32 = vpop.f32.mrb[13].mxu1 }
 0x319   :  { %v1126_v54 = vadd.f32 %v1125_v32, %v1124_v5  ;;  %v1127_v28 = vpop.f32.mrb[14].mxu1 }
 0x31a   :  { %v1128_v33 = vpop.f32.mrb[15].mxu1 }
 0x31b   :  { %v1013_v55 = vadd.f32 %v1126_v54, %v1766_v61  ;;  %v1129_v34 = vadd.f32 %v1128_v33, %v1127_v28 }
 0x31d   :  { %1029 = vst [vmem:[#allocation4 + $0x30] sm:$0xff] %v1013_v55  ;;  %v1014_v35 = vadd.f32 %v1129_v34, %v1766_v61 }
 0x31f   :  { %1030 = vst [vmem:[#allocation4 + $0x38] sm:$0xff] %v1014_v35  ;;  %v1130_v7 = vpop.f32.mrb[16].mxu1 }
 0x320   :  { %v1131_v37 = vpop.f32.mrb[17].mxu1 }
 0x321   :  { %v1132_v41 = vadd.f32 %v1131_v37, %v1130_v7  ;;  %v1133_v11 = vpop.f32.mrb[18].mxu1 }
 0x322   :  { %v1134_v42 = vpop.f32.mrb[19].mxu1 }
 0x323   :  { %v1015_v1 = vadd.f32 %v1132_v41, %v1766_v61  ;;  %v1135_v0 = vadd.f32 %v1134_v42, %v1133_v11 }
 0x325   :  { %1031 = vst [vmem:[#allocation4 + $0x40] sm:$0xff] %v1015_v1  ;;  %v1016_v44 = vadd.f32 %v1135_v0, %v1766_v61 }
 0x327   :  { %1032 = vst [vmem:[#allocation4 + $0x48] sm:$0xff] %v1016_v44  ;;  %v1136_v45 = vpop.f32.mrb[20].mxu1 }
 0x328   :  { %v1137_v48 = vpop.f32.mrb[21].mxu1 }
 0x329   :  { %v1138_v10 = vadd.f32 %v1137_v48, %v1136_v45  ;;  %v1139_v51 = vpop.f32.mrb[22].mxu1 }
 0x32a   :  { %v1140_v52 = vpop.f32.mrb[23].mxu1 }
 0x32b   :  { %v1017_v53 = vadd.f32 %v1138_v10, %v1766_v61  ;;  %v1141_v56 = vadd.f32 %v1140_v52, %v1139_v51 }
 0x32d   :  { %1033 = vst [vmem:[#allocation4 + $0x50] sm:$0xff] %v1017_v53  ;;  %v1018_v57 = vadd.f32 %v1141_v56, %v1766_v61 }
 0x32f   :  { %1034 = vst [vmem:[#allocation4 + $0x58] sm:$0xff] %v1018_v57  ;;  %v1142_v58 = vpop.f32.mrb[24].mxu1 }
 0x330   :  { %v1143_v22 = vpop.f32.mrb[25].mxu1 }
 0x331   :  { %v1144_v40 = vadd.f32 %v1143_v22, %v1142_v58  ;;  %v1145_v24 = vpop.f32.mrb[26].mxu1 }
 0x332   :  { %v1146_v31 = vpop.f32.mrb[27].mxu1 }
 0x333   :  { %v1019_v8 = vadd.f32 %v1144_v40, %v1766_v61  ;;  %v1147_v43 = vadd.f32 %v1146_v31, %v1145_v24 }
 0x335   :  { %1035 = vst [vmem:[#allocation4 + $0x60] sm:$0xff] %v1019_v8  ;;  %v1020_v36 = vadd.f32 %v1147_v43, %v1766_v61 }
 0x337   :  { %1036 = vst [vmem:[#allocation4 + $0x68] sm:$0xff] %v1020_v36  ;;  %v1148_v49 = vpop.f32.mrb[28].mxu1 }
 0x338   :  { %v1149_v50 = vpop.f32.mrb[29].mxu1 }
 0x339   :  { %v1150_v9 = vadd.f32 %v1149_v50, %v1148_v49  ;;  %v1151_v39 = vpop.f32.mrb[30].mxu1 }
 0x33a   :  { %v1152_v13 = vpop.f32.mrb[31].mxu1 }
 0x33b   :  { %v1021_v59 = vadd.f32 %v1150_v9, %v1766_v61  ;;  %v1153_v23 = vadd.f32 %v1152_v13, %v1151_v39 }
 0x33d   :  { %1037 = vst [vmem:[#allocation4 + $0x70] sm:$0xff] %v1021_v59  ;;  %v1022_v38 = vadd.f32 %v1153_v23, %v1766_v61 }
 0x33f   :  { %1038 = vst [vmem:[#allocation4 + $0x78] sm:$0xff] %v1022_v38 }
 0x340   :  { %1305 = shalt.err (!%p1302_p4)
}
 0x341   :  { %s1306_s29 = scalar_lea.hbm %s1803_s7, 2048 }
 0x342   :  { %p1307_p5 = scmp.ne.s32.totalorder %s1803_s7, %s1306_s29  ;;  %p1310_p6 = scmp.lt.u32.totalorder %s1306_s29, %s1803_s7 }
 0x344   :  { %p1312_p7 = pnand %p1310_p6, %p1307_p5 }
 0x346   :  { %1315 = shalt.err (!%p1312_p7)
}
 0x347   :  { %s1320_s11 = smov 128   ;;  %s1321_s12 = smov 8  }
 0x348   :  { %1050 = dma.vmem_to_hbm [thread:$0]  %s1045_s27, 2048, %s1803_s7, [#allocation5], %s1320_s11, %s1320_s11, %s1321_s12  }
 0x349   :  { %1316 = dma.done.wait [#allocation5], 2048  }
 0x34a   :  { %1317 = vsyncadd [#allocation5], 4294965248 }
 0x34b   :  { %1054 = vsyncpa [#allocation5], 1 }

</bundles_post_ra>
